<compile_context>
chip_gen: v7x
topology: tpu7x:2x2x1
jax: 0.10.0
libtpu: 0.0.40
codegen_flags: <defaults>
</compile_context>

<pallas_src>
import jax
import jax.numpy as jnp
from jax.experimental import pallas as pl
from jax.experimental.pallas import tpu as pltpu

_SUB = 8
_LANE = 128


def _softsign_kernel(x_ref, o_ref):
    # Upcast to f32 for the math (v5e has no bf16 VALU/EUP); casts ride in spare
    # VALU slots of a mem-bound loop, so they are free. Store in native dtype.
    x = x_ref[...].astype(jnp.float32)
    o_ref[...] = (x / (1.0 + jnp.abs(x))).astype(o_ref.dtype)


def _softsign_2d(x2d: jax.Array) -> jax.Array:
    rows, width = x2d.shape
    itemsize = jnp.dtype(x2d.dtype).itemsize

    # Target ~2 MiB per block buffer (input + output, each double-buffered -> ~8 MiB VMEM).
    target_bytes = 2 * 1024 * 1024
    br = max(_SUB, (target_bytes // (width * itemsize)) // _SUB * _SUB)

    # Keep at least 2 grid steps when there is enough work (v7x: 2 TensorCores).
    if rows > _SUB:
        half = -(-rows // 2)
        half = -(-half // _SUB) * _SUB  # round up to a multiple of 8
        if half < rows:
            br = min(br, half)

    if br >= rows:
        br = rows  # single full-extent block (legal even if rows % 8 != 0)

    grid = (pl.cdiv(rows, br),)

    return pl.pallas_call(
        _softsign_kernel,
        out_shape=jax.ShapeDtypeStruct((rows, width), x2d.dtype),
        grid_spec=pltpu.PrefetchScalarGridSpec(
            num_scalar_prefetch=0,
            grid=grid,
            in_specs=[pl.BlockSpec((br, width), lambda i: (i, 0))],
            out_specs=pl.BlockSpec((br, width), lambda i: (i, 0)),
        ),
        compiler_params=pltpu.CompilerParams(
            dimension_semantics=("parallel",),
        ),
    )(x2d)


def softsign(x: jax.Array) -> jax.Array:
    """Applies softsign elementwise; runs end-to-end in the input's native dtype."""
    orig_shape = x.shape
    n = x.size
    if n == 0:
        return x

    # Widest lane-dense slab width that divides n exactly (no pad/slice HBM passes).
    width = None
    for w in (8192, 4096, 2048, 1024, 512, 256, 128):
        if n % w == 0:
            width = w
            break

    if width is not None:
        out2d = _softsign_2d(x.reshape(n // width, width))
        return out2d.reshape(orig_shape)

    # Ragged fallback: pad flat tail to a multiple of 128 (softsign(0)=0, pad dropped).
    n_pad = -(-n // _LANE) * _LANE
    x_flat = jnp.pad(jnp.ravel(x), (0, n_pad - n))
    out2d = _softsign_2d(x_flat.reshape(n_pad // _LANE, _LANE))
    return out2d.reshape(-1)[:n].reshape(orig_shape)


if __name__ == "__main__":
    key = jax.random.PRNGKey(0)

    # Main case: NCHW f32, divides the slab width exactly (no padding path).
    x = jax.random.normal(key, (2, 4, 16, 16), dtype=jnp.float32)
    y = softsign(x)
    jax.block_until_ready(y)
    y_ref = x / (1.0 + jnp.abs(x))
    assert y.shape == x.shape and y.dtype == x.dtype
    assert jnp.allclose(y, y_ref, atol=1e-6, rtol=1e-6), "f32 mismatch vs reference"

    # bf16 case: slab stays bf16 in HBM, kernel computes in f32, stores bf16.
    xb = jax.random.normal(jax.random.PRNGKey(1), (2, 4, 16, 16), dtype=jnp.bfloat16)
    yb = softsign(xb)
    jax.block_until_ready(yb)
    xb32 = xb.astype(jnp.float32)
    yb_ref = (xb32 / (1.0 + jnp.abs(xb32))).astype(jnp.bfloat16)
    assert yb.dtype == jnp.bfloat16
    assert jnp.allclose(yb.astype(jnp.float32), yb_ref.astype(jnp.float32),
                        atol=2e-2, rtol=2e-2), "bf16 mismatch vs reference"

    # Ragged case (n % 128 != 0): exercises the padded fallback path.
    xr = jax.random.normal(jax.random.PRNGKey(2), (3, 5, 7), dtype=jnp.float32)
    yr = softsign(xr)
    jax.block_until_ready(yr)
    yr_ref = xr / (1.0 + jnp.abs(xr))
    assert yr.shape == xr.shape and yr.dtype == xr.dtype
    assert jnp.allclose(yr, yr_ref, atol=1e-6, rtol=1e-6), "ragged mismatch vs reference"

    print("KERNEL_OK")
</pallas_src>

<mosaic_0001>
module attributes {stable_mosaic.version = 11 : i64} {
  func.func @_softsign_kernel(%arg0: i32, %arg1: memref<1x2048xf32, #tpu.memory_space<vmem>>, %arg2: memref<1x2048xf32, #tpu.memory_space<vmem>>) attributes {dimension_semantics = [#tpu.dimension_semantics<parallel>], iteration_bounds = array<i64: 1>, scalar_prefetch = 0 : i64, scratch_operands = 0 : i64, tpu.core_type = #tpu.core_type<tc>, window_params = [{transform_indices = @transform_0, window_bounds = array<i64: 1, 2048>}, {transform_indices = @transform_1, window_bounds = array<i64: 1, 2048>}]} {
    %c0 = arith.constant 0 : index
    %c0_0 = arith.constant 0 : index
    %0 = vector.load %arg1[%c0, %c0_0] : memref<1x2048xf32, #tpu.memory_space<vmem>>, vector<1x2048xf32>
    %1 = math.absf %0 : vector<1x2048xf32>
    %cst = arith.constant 1.000000e+00 : f32
    %2 = vector.broadcast %cst : f32 to vector<1x2048xf32>
    %3 = arith.addf %2, %1 : vector<1x2048xf32>
    %4 = arith.divf %0, %3 : vector<1x2048xf32>
    %c0_1 = arith.constant 0 : index
    %c0_2 = arith.constant 0 : index
    %5 = vector.load %arg2[%c0_1, %c0_2] : memref<1x2048xf32, #tpu.memory_space<vmem>>, vector<1x2048xf32>
    tpu.vector_store %arg2[%c0_1, %c0_2], %4 {strides = array<i32>} : memref<1x2048xf32, #tpu.memory_space<vmem>>, vector<1x2048xf32>,
    return
  }
  func.func @transform_0(%arg0: i32) -> (i32, i32) {
    %c0_i32 = arith.constant 0 : i32
    %c0_i32_0 = arith.constant 0 : i32
    return %arg0, %c0_i32 : i32, i32
  }
  func.func @transform_1(%arg0: i32) -> (i32, i32) {
    %c0_i32 = arith.constant 0 : i32
    %c0_i32_0 = arith.constant 0 : i32
    return %arg0, %c0_i32 : i32, i32
  }
}

</mosaic_0001>

<bundles_post_ra>
// kernel: tpu_custom_call.1
= control target key start
LH: loop header
LB: loop body
LE: loop exit
PB: predicated region body
PF: predicated region fallthrough
CT: control target
= control target key end

     0   :  { %6 = vsyncpa [#allocation3], 0  ;;  %s138_s0 = inlined_call_operand.hbm [shape: f32[1,2048], index: 0, kind: input, shape index: {}]   ;;  %s139_s1 = inlined_call_operand.hbm [shape: f32[1,2048], index: 1, kind: output, shape index: {}]  }
   0x1   :  { %7 = vsyncpa [#allocation4], 0  ;;  %s102_s6 = smov [#allocation2]   ;;  %s54_s10 = scalar_lea.hbm %s138_s0, 256 }
   0x2   :  { %s14_s7 = sshll.u32 %s102_s6, 4  ;;  %p55_p0 = scmp.ne.s32.totalorder %s138_s0, %s54_s10  ;;  %s15_s7 = int_to_ptr.vmem [resolvable:$true] %s14_s7 }
   0x3   :  { %p58_p1 = scmp.lt.u32.totalorder %s54_s10, %s138_s0 }
   0x5   :  { %p60_p2 = pnand %p58_p1, %p55_p0 }
   0x7   :  { %63 = shalt.err (!%p60_p2)
}
   0x8   :  { %s64_s15 = scalar_lea.vmem %s15_s7, 256  ;;  %p69_p4 = scmp.lt.s32.totalorder %s15_s7, %s15_s7 }
   0x9   :  { %p65_p3 = scmp.ne.s32.totalorder %s15_s7, %s64_s15  ;;  %p70_p5 = scmp.lt.s32.totalorder %s64_s15, %s64_s15 }
   0xb   :  { %p71_p6 = por %p70_p5, %p69_p4 }
   0xd   :  { %p72_p7 = pnand %p71_p6, %p65_p3 }
   0xf   :  { %75 = shalt.err (!%p72_p7)
}
  0x10   :  { %17 = dma.hbm_to_vmem [thread:$0]  %s138_s0, 256, %s15_s7, [#allocation3]  }
  0x11   :  { %98 = dma.done.wait [#allocation3], 256  }
  0x12   :  { %99 = vsyncadd [#allocation3], 4294967040  ;;  %v21_v0 = vld [vmem:[#allocation2] sm:$0xff]  ;;  %v22_v1 = vld [vmem:[#allocation2 + $0x8] sm:$0xff]  ;;  %s103_s18 = smov [#allocation5]  }
  0x13   :  { %v23_v2 = vand.u32 2147483647, %v21_v0  ;;  %v24_v3 = vand.u32 2147483647, %v22_v1  ;;  %s39_s19 = sshll.u32 %s103_s18, 4  ;;  %s40_s19 = int_to_ptr.vmem [resolvable:$true] %s39_s19 }
  0x14   :  { %s76_s0 = scalar_lea.vmem %s40_s19, 256  ;;  %p81_p9 = scmp.lt.s32.totalorder %s40_s19, %s40_s19 }
  0x15   :  { %v25_v4 = vadd.f32 1.0, %v23_v2  ;;  %v26_v5 = vadd.f32 1.0, %v24_v3  ;;  %p77_p8 = scmp.ne.s32.totalorder %s40_s19, %s76_s0  ;;  %p82_p10 = scmp.lt.s32.totalorder %s76_s0, %s76_s0 }
  0x17   :  { %50 = vrcp.f32 %v25_v4  ;;  %p83_p11 = por %p82_p10, %p81_p9 }
  0x18   :  { %52 = vrcp.f32 %v26_v5 }
  0x19   :  { %p84_p12 = pnand %p83_p11, %p77_p8 }
  0x21   :  { %v51_v6 = vpop.eup %50 }
  0x22   :  { %v53_v7 = vpop.eup %52  ;;  %v28_v8 = vmul.f32 %v51_v6, %v21_v0 }
  0x23   :  { %v30_v9 = vmul.f32 %v53_v7, %v22_v1 }
  0x24   :  { %31 = vst [vmem:[#allocation5] sm:$0xff] %v28_v8 }
  0x25   :  { %32 = vst [vmem:[#allocation5 + $0x8] sm:$0xff] %v30_v9 }
  0x26   :  { %87 = shalt.err (!%p84_p12)
}
  0x27   :  { %s88_s22 = scalar_lea.hbm %s139_s1, 256 }
  0x28   :  { %p89_p13 = scmp.ne.s32.totalorder %s139_s1, %s88_s22  ;;  %p92_p0 = scmp.lt.u32.totalorder %s88_s22, %s139_s1 }
  0x2a   :  { %p94_p1 = pnand %p92_p0, %p89_p13 }
  0x2c   :  { %97 = shalt.err (!%p94_p1)
}
  0x2d   :  { %42 = dma.vmem_to_hbm [thread:$0]  %s40_s19, 256, %s139_s1, [#allocation4]  }
  0x2e   :  { %100 = dma.done.wait [#allocation4], 256  }
  0x2f   :  { %101 = vsyncadd [#allocation4], 4294967040 }
  0x30   :  { %46 = vsyncpa [#allocation3], 1 }
  0x31   :  { %47 = vsyncpa [#allocation4], 1 }

</bundles_post_ra>
